<compile_context>
chip_gen: v5e
topology: v5e:2x2
jax: 0.10.0
libtpu: 0.0.40
codegen_flags: <defaults>
</compile_context>

<pallas_src>
import jax
import jax.numpy as jnp
import numpy as np
from jax.experimental import pallas as pl
from jax.experimental.pallas import tpu as pltpu


# ------------------------------ Pallas kernels -------------------------------
def tt_fused_kernel(x_ref, m_ref, b_ref, o_ref):
    """out = x @ M + bias.  x arrives in its original dtype and is cast to the
    weight dtype (bf16) in-kernel; f32 MXU accumulation; f32 output."""
    xb = x_ref[...].astype(m_ref.dtype)
    acc = jnp.dot(xb, m_ref[...], preferred_element_type=jnp.float32)
    o_ref[...] = acc + b_ref[...]


def tt_factored_kernel(x_ref, a_ref, w_ref, b_ref, o_ref):
    """out = (x @ A) @ W + bias.  The intermediate t stays f32 (no extra bf16
    round-trip, per the correctness review)."""
    xb = x_ref[...].astype(a_ref.dtype)
    t = jnp.dot(xb, a_ref[...], preferred_element_type=jnp.float32)
    o_ref[...] = (
        jnp.dot(t, w_ref[...].astype(jnp.float32),
                preferred_element_type=jnp.float32)
        + b_ref[...]
    )


# ---------------------- parameter-only pre-contraction -----------------------
def build_input_matrix(input_cores):
    """Chain input cores into A of shape (2**input_dim, rank)."""
    a = input_cores[0]                        # (2, r)
    for core in input_cores[1:]:              # (r, 2, r)
        a = jnp.einsum('...r,rjs->...js', a, core)
    d = len(input_cores)
    return a.reshape(2 ** d, a.shape[-1])     # row-major: i1 most significant


def build_output_matrix(output_cores):
    """Chain output cores into W of shape (rank, 2**output_dim)."""
    w = output_cores[0]                       # (r, 2, r) or (r, 2)
    for core in output_cores[1:]:
        if core.ndim == 3:                    # (r, 2, r)
            w = jnp.einsum('r...s,sjt->r...jt', w, core)
        else:                                 # last core (r, 2)
            w = jnp.einsum('r...s,sj->r...j', w, core)
    return w.reshape(w.shape[0], -1)          # row-major: o1 most significant


# --------------------------------- helpers -----------------------------------
def _round_up(x: int, m: int) -> int:
    return ((x + m - 1) // m) * m


def _vmem_capacity_bytes() -> int:
    """Per-core VMEM capacity; 64 MiB fallback is safe on every generation."""
    try:
        info = pltpu.get_tpu_info()
        cap = getattr(info, "vmem_capacity_bytes", None)
        if cap:
            return int(cap)
    except Exception:
        pass
    return 64 * 1024 * 1024


def _choose_batch_tile(b_pad: int, per_row_bytes: int, budget_bytes: int,
                       max_tile: int = 8192, min_tile: int = 8) -> int:
    """Largest multiple-of-8 batch tile that (a) fits the streaming VMEM
    budget, (b) divides the (8-aligned) padded batch, and (c) keeps at least
    two grid steps when the batch allows it (v7x megacore split)."""
    tb = budget_bytes // max(per_row_bytes, 1)
    tb = max(min_tile, min(max_tile, (tb // min_tile) * min_tile))
    tb = min(tb, b_pad)
    if tb >= b_pad and b_pad >= 2 * min_tile:
        tb = max(min_tile, _round_up(b_pad // 2, min_tile))
    while b_pad % tb != 0:            # b_pad is a multiple of 8 -> terminates
        tb -= min_tile
    return tb


# --------------------------------- the layer ----------------------------------
class TTLayerPallas:
    """JAX/Pallas port of the PyTorch TTLayer forward pass.

    The TT cores are parameter-only, so they are pre-contracted once at
    construction into A (2**input_dim, rank) and W (rank, 2**output_dim); for
    feature sizes where the dense M = A @ W fits comfortably in VMEM the hot
    path is a single MXU pass out = x @ M + bias."""

    def __init__(self, input_dim: int, output_dim: int, rank: int = 10,
                 key=None, compute_dtype=jnp.bfloat16, force_factored=False):
        if key is None:
            key = jax.random.PRNGKey(0)
        mean, std = 0.0, 0.5
        keys = jax.random.split(key, input_dim + output_dim + 1)
        ki = 0

        self.input_cores = [mean + std * jax.random.normal(keys[ki], (2, rank))]
        ki += 1
        for _ in range(input_dim - 1):
            self.input_cores.append(
                mean + std * jax.random.normal(keys[ki], (rank, 2, rank)))
            ki += 1

        self.output_cores = []
        for _ in range(output_dim - 1):
            self.output_cores.append(
                mean + std * jax.random.normal(keys[ki], (rank, 2, rank)))
            ki += 1
        self.output_cores.append(
            mean + std * jax.random.normal(keys[ki], (rank, 2)))
        ki += 1

        self.bias = mean + std * jax.random.normal(keys[ki], (1, 2 ** output_dim))

        self.input_dim, self.output_dim, self.rank = input_dim, output_dim, rank
        self.compute_dtype = compute_dtype
        self.in_f = 2 ** input_dim
        self.out_f = 2 ** output_dim
        self.r_pad = _round_up(rank, 8)

        vmem_cap = _vmem_capacity_bytes()
        # ~48 MiB cap on v7x (64 MiB/TC), ~96 MiB on v5e/v6e (128 MiB).
        self.vmem_limit_cap = min(int(0.75 * vmem_cap), 100 * 1024 * 1024)
        fused_cap = vmem_cap // 4            # ~16 MiB v7x, ~32 MiB v5e/v6e

        # Parameter-only pre-contraction (done once, cached on device).
        A = build_input_matrix(self.input_cores).astype(jnp.float32)   # (in_f, r)
        W = build_output_matrix(self.output_cores).astype(jnp.float32) # (r, out_f)
        self.bias_f32 = self.bias.astype(jnp.float32)                  # (1, out_f)

        m_bytes = self.in_f * self.out_f * jnp.dtype(compute_dtype).itemsize
        self.use_fused = (not force_factored) and (m_bytes <= fused_cap)
        if self.use_fused:
            self.M_q = (A @ W).astype(compute_dtype)                   # (in_f, out_f)
        else:
            pad_r = self.r_pad - rank
            self.A_q = jnp.pad(A, ((0, 0), (0, pad_r))).astype(compute_dtype)
            self.W_q = jnp.pad(W, ((0, pad_r), (0, 0))).astype(compute_dtype)

    def __call__(self, x, max_batch_tile: int = 8192):
        B = x.shape[0]
        in_f, out_f = self.in_f, self.out_f

        # Pad batch only to a multiple of 8 (a no-op for aligned batches).
        b_pad = _round_up(B, 8)
        x_in = x if b_pad == B else jnp.pad(x, ((0, b_pad - B), (0, 0)))

        x_bytes = jnp.dtype(x_in.dtype).itemsize
        if self.use_fused:
            weight_bytes = self.M_q.size * self.M_q.dtype.itemsize
        else:
            weight_bytes = (self.A_q.size * self.A_q.dtype.itemsize
                            + self.W_q.size * self.W_q.dtype.itemsize)
            # Keep the (tb, r_pad) f32 intermediate small in the factored path.
            max_batch_tile = min(max_batch_tile, 1024)
        weight_bytes += self.bias_f32.size * 4

        # Double-buffered streaming footprint per batch row (x in + out out).
        per_row = 2 * (in_f * x_bytes + out_f * 4)
        stream_budget = max(self.vmem_limit_cap // 2 - 2 * weight_bytes,
                            16 * per_row)
        tb = _choose_batch_tile(b_pad, per_row, stream_budget,
                                max_tile=max_batch_tile)
        grid = (b_pad // tb,)

        # Explicit VMEM accounting (per_row already double-buffered -> no 2x).
        need_bytes = tb * per_row + 2 * weight_bytes + (4 << 20)
        vmem_limit = int(min(self.vmem_limit_cap, max(need_bytes, 16 << 20)))

        cparams = pltpu.CompilerParams(
            dimension_semantics=("parallel",),       # megacore split on v7x
            vmem_limit_bytes=vmem_limit)

        out_shape = jax.ShapeDtypeStruct((b_pad, out_f), jnp.float32)
        x_spec = pl.BlockSpec((tb, in_f), lambda i: (i, 0))
        bias_spec = pl.BlockSpec((1, out_f), lambda i: (0, 0))
        out_spec = pl.BlockSpec((tb, out_f), lambda i: (i, 0))

        if self.use_fused:
            out = pl.pallas_call(
                tt_fused_kernel,
                out_shape=out_shape,
                grid=grid,
                in_specs=[x_spec,
                          pl.BlockSpec((in_f, out_f), lambda i: (0, 0)),
                          bias_spec],
                out_specs=out_spec,
                compiler_params=cparams,
            )(x_in, self.M_q, self.bias_f32)
        else:
            out = pl.pallas_call(
                tt_factored_kernel,
                out_shape=out_shape,
                grid=grid,
                in_specs=[x_spec,
                          pl.BlockSpec((in_f, self.r_pad), lambda i: (0, 0)),
                          pl.BlockSpec((self.r_pad, out_f), lambda i: (0, 0)),
                          bias_spec],
                out_specs=out_spec,
                compiler_params=cparams,
            )(x_in, self.A_q, self.W_q, self.bias_f32)

        # Only the batch padding (if any) is dropped; no feature-axis slice.
        return out if b_pad == B else out[:B]


# ----------------------- independent pure-JAX reference ----------------------
def reference_forward(x, input_cores, output_cores, bias):
    B = x.shape[0]
    d = len(input_cores)
    t = x.reshape((B,) + (2,) * d)
    t = jnp.tensordot(t, input_cores[0], axes=[[1], [0]])      # (B, i2..id, r)
    for core in input_cores[1:]:
        t = jnp.tensordot(t, core, axes=[[t.ndim - 1, 1], [0, 1]])
    out = t                                                     # (B, r)
    for core in output_cores:
        out = jnp.tensordot(out, core, axes=[[out.ndim - 1], [0]])
    out = out.reshape(B, -1)
    return out + bias


def _assert_close(out, ref):
    # bf16 input/weight quantization bounds the error well below 2% of the
    # output dynamic range for these shapes.
    scale = float(jnp.max(jnp.abs(ref)))
    np.testing.assert_allclose(np.asarray(out), np.asarray(ref),
                               rtol=3e-2, atol=2e-2 * scale)


# ------------------------------------ main ------------------------------------
if __name__ == "__main__":
    input_dim, output_dim, rank = 5, 5, 10        # x: (B, 32) -> out: (B, 32)
    root = jax.random.PRNGKey(0)
    pkey, xkey1, xkey2 = jax.random.split(root, 3)

    # --- test 1: fused single-matmul path, aligned batch, single grid step ---
    layer = TTLayerPallas(input_dim, output_dim, rank, key=pkey)
    x1 = jax.random.normal(xkey1, (8, 2 ** input_dim), dtype=jnp.float32)
    out1 = layer(x1)
    jax.block_until_ready(out1)
    assert out1.shape == (8, 2 ** output_dim)
    assert out1.dtype == jnp.float32
    ref1 = reference_forward(x1, layer.input_cores, layer.output_cores,
                             layer.bias)
    _assert_close(out1, ref1)

    # --- test 2: factored two-matmul path, ragged batch, multi-step grid ---
    layer2 = TTLayerPallas(input_dim, output_dim, rank, key=pkey,
                           force_factored=True)
    x2 = jax.random.normal(xkey2, (50, 2 ** input_dim), dtype=jnp.float32)
    out2 = layer2(x2, max_batch_tile=16)          # -> b_pad=56, tb=8, grid=(7,)
    jax.block_until_ready(out2)
    assert out2.shape == (50, 2 ** output_dim)
    ref2 = reference_forward(x2, layer2.input_cores, layer2.output_cores,
                             layer2.bias)
    _assert_close(out2, ref2)

    print("KERNEL_OK")
</pallas_src>

<mosaic_0001>
module attributes {stable_mosaic.version = 11 : i64} {
  func.func @tt_fused_kernel(%arg0: i32, %arg1: memref<8x32xf32, #tpu.memory_space<vmem>>, %arg2: memref<32x32xbf16, #tpu.memory_space<vmem>>, %arg3: memref<1x32xf32, #tpu.memory_space<vmem>>, %arg4: memref<8x32xf32, #tpu.memory_space<vmem>>) attributes {dimension_semantics = [#tpu.dimension_semantics<parallel>], iteration_bounds = array<i64: 1>, scalar_prefetch = 0 : i64, scratch_operands = 0 : i64, tpu.core_type = #tpu.core_type<tc>, window_params = [{transform_indices = @transform_0, window_bounds = array<i64: 8, 32>}, {pipeline_mode = #tpu.pipeline_mode<synchronous>, transform_indices = @transform_1, window_bounds = array<i64: 32, 32>}, {pipeline_mode = #tpu.pipeline_mode<synchronous>, transform_indices = @transform_2, window_bounds = array<i64: 1, 32>}, {transform_indices = @transform_3, window_bounds = array<i64: 8, 32>}]} {
    %c0 = arith.constant 0 : index
    %c0_0 = arith.constant 0 : index
    %0 = vector.load %arg1[%c0, %c0_0] : memref<8x32xf32, #tpu.memory_space<vmem>>, vector<8x32xf32>
    %1 = arith.truncf %0 : vector<8x32xf32> to vector<8x32xbf16>
    %c0_1 = arith.constant 0 : index
    %c0_2 = arith.constant 0 : index
    %2 = vector.load %arg2[%c0_1, %c0_2] : memref<32x32xbf16, #tpu.memory_space<vmem>>, vector<32x32xbf16>
    %cst = arith.constant dense<0.000000e+00> : vector<8x32xf32>
    %3 = tpu.matmul %1, %2, %cst {dimension_numbers = #tpu.dot_dimension_numbers<[1], [0], [0], [1], [0, 0, 1, 1], [], []>} : vector<8x32xbf16>, vector<32x32xbf16>, vector<8x32xf32> -> vector<8x32xf32>
    %c0_3 = arith.constant 0 : index
    %c0_4 = arith.constant 0 : index
    %4 = vector.load %arg3[%c0_3, %c0_4] : memref<1x32xf32, #tpu.memory_space<vmem>>, vector<1x32xf32>
    %5 = vector.broadcast %4 : vector<1x32xf32> to vector<8x32xf32>
    %6 = arith.addf %3, %5 : vector<8x32xf32>
    %c0_5 = arith.constant 0 : index
    %c0_6 = arith.constant 0 : index
    %7 = vector.load %arg4[%c0_5, %c0_6] : memref<8x32xf32, #tpu.memory_space<vmem>>, vector<8x32xf32>
    tpu.vector_store %arg4[%c0_5, %c0_6], %6 {strides = array<i32>} : memref<8x32xf32, #tpu.memory_space<vmem>>, vector<8x32xf32>,
    return
  }
  func.func @transform_0(%arg0: i32) -> (i32, i32) {
    %c0_i32 = arith.constant 0 : i32
    %c0_i32_0 = arith.constant 0 : i32
    return %arg0, %c0_i32 : i32, i32
  }
  func.func @transform_1(%arg0: i32) -> (i32, i32) {
    %c0_i32 = arith.constant 0 : i32
    %c0_i32_0 = arith.constant 0 : i32
    %c0_i32_1 = arith.constant 0 : i32
    return %c0_i32, %c0_i32_0 : i32, i32
  }
  func.func @transform_2(%arg0: i32) -> (i32, i32) {
    %c0_i32 = arith.constant 0 : i32
    %c0_i32_0 = arith.constant 0 : i32
    %c0_i32_1 = arith.constant 0 : i32
    return %c0_i32, %c0_i32_0 : i32, i32
  }
  func.func @transform_3(%arg0: i32) -> (i32, i32) {
    %c0_i32 = arith.constant 0 : i32
    %c0_i32_0 = arith.constant 0 : i32
    return %arg0, %c0_i32 : i32, i32
  }
}

</mosaic_0001>

<bundles_post_ra>
// kernel: tpu_custom_call.1
= control target key start
LH: loop header
LB: loop body
LE: loop exit
PB: predicated region body
PF: predicated region fallthrough
CT: control target
= control target key end

     0   :  { %8 = vsyncpa [#allocation3], 0  ;;  %s236_s0 = inlined_call_operand.hbm [shape: f32[8,32], index: 0, kind: input, shape index: {}]   ;;  %s237_s1 = inlined_call_operand.hbm [shape: bf16[32,32], index: 1, kind: input, shape index: {}]   ;;  %s238_s2 = inlined_call_operand.vmem [shape: f32[1,32], index: 2, kind: input, shape index: {}]   ;;  %s239_s3 = inlined_call_operand.hbm [shape: f32[8,32], index: 3, kind: output, shape index: {}]  }
   0x1   :  { %9 = vsyncpa [#allocation6], 0 }
   0x2   :  { %10 = vsyncpa [#allocation4], 0  ;;  %s16_s14 = sshll.u32 %s236_s0, 4  ;;  %s199_s15 = smov [#allocation2]   ;;  %s17_s14 = int_to_ptr.hbm [resolvable:$true] %s16_s14 }
   0x3   :  { %s18_s16 = sshll.u32 %s199_s15, 4  ;;  %s26_s19 = sshll.u32 %s237_s1, 4  ;;  %s19_s16 = int_to_ptr.vmem [resolvable:$true] %s18_s16  ;;  %s27_s19 = int_to_ptr.hbm [resolvable:$true] %s26_s19 }
   0x4   :  { %21 = dma.hbm_to_vmem [thread:$0]  %s17_s14, 128, %s19_s16, [#allocation3]  }
   0x5   :  { %s200_s20 = smov [#allocation5]   ;;  %s201_s22 = smov 64  }
   0x6   :  { %s28_s21 = sshll.u32 %s200_s20, 4  ;;  %s202_s23 = smov 4   ;;  %s29_s21 = int_to_ptr.vmem [resolvable:$true] %s28_s21 }
   0x7   :  { %34 = dma.hbm_to_vmem [thread:$0]  %s27_s19, 256, %s29_s21, [#allocation6], %s201_s22, %s201_s22, %s202_s23  }
   0x8   :  { %193 = dma.done.wait [#allocation3], 128  }
   0x9   :  { %194 = vsyncadd [#allocation3], 4294967168 }
   0xa   :  { %195 = dma.done.wait [#allocation6], 256  }
   0xb   :  { %196 = vsyncadd [#allocation6], 4294967040  ;;  %v114_v0 = vld [vmem:[#allocation5 + $0x8] sm:$0xff]  ;;  %v113_v1 = vld [vmem:[#allocation5] sm:$0xff]  ;;  %vm68_vm0 = vcmask 261120   ;;  %s203_s24 = smov [#allocation7]  }
   0xc   :  { %78 = vmatpush.bf16.msra.mxu0 %v114_v0  ;;  %v46_v2 = vld [vmem:[#allocation2] sm:$0xff]  ;;  %s91_s25 = sshll.u32 %s203_s24, 4  ;;  %s93_s28 = sshll.u32 %s239_s3, 4  ;;  %s92_s25 = int_to_ptr.vmem [resolvable:$true] %s91_s25  ;;  %s94_s28 = int_to_ptr.hbm [resolvable:$true] %s93_s28 }
   0xd   :  { %v47_v3 = vpack.c.bf16 %v46_v2, %v46_v2  ;;  %v120_v4 = vld [vmem:[%s238_s2] ss:$0 sm:$0xff] }
  0x10   :  { %79 = vmatpush.bf16.msra.mxu0 %v113_v1 }
  0x13   :  { %112 = vmatmul.msk.bf16.vlgmr.msra.gmra.mxu0 %vm68_vm0, %v47_v3 }
  0x90   :  { %v81_v5 = vpop.f32.mrf.mxu0 }
  0x91   :  { %v82_v6 = vadd.f32 %v120_v4, %v81_v5 }
  0x93   :  { %85 = vst.msk [vmem:[#allocation7] sm:$0xff] %vm68_vm0, %v82_v6 }
  0x94   :  { %96 = dma.vmem_to_hbm [thread:$0]  %s92_s25, 128, %s94_s28, [#allocation4]  }
  0x98   :  { %v83_v7 = vpop.f32.mrf.mxu0 }
  0x99   :  { %197 = dma.done.wait [#allocation4], 128  }
  0x9a   :  { %198 = vsyncadd [#allocation4], 4294967168 }
  0x9b   :  { %101 = vsyncpa [#allocation3], 1 }
  0x9c   :  { %102 = vsyncpa [#allocation6], 1 }
  0x9d   :  { %103 = vsyncpa [#allocation4], 1 }

</bundles_post_ra>
